<compile_context>
chip_gen: v7x
topology: tpu7x:2x2x1
jax: 0.10.0
libtpu: 0.0.40
codegen_flags: <defaults>
</compile_context>

<pallas_src>
import functools

import jax
import jax.numpy as jnp
from jax.experimental import pallas as pl
from jax.experimental.pallas import tpu as pltpu


def rnn_last_linear_kernel(ids_ref, embp_ref, whh_ref, wlin_ref, blin_ref,
                           out_ref, *, T, B):
    """Fused embedding/input-projection gather + unrolled tanh RNN + Linear."""
    H = whh_ref.shape[1]

    # Fused embedding gather + hoisted input projection:
    #   x_t[b] = emb_proj[ids[b, t]]  (= emb[id] @ W_ih^T + b_ih + b_hh)
    # Token ids are SMEM scalars; each row is a dynamic (1, H) VMEM load.
    # All of this is h-independent, so it is built before the recurrence and
    # can be hidden under the serial matmul chain by the scheduler.
    x_steps = []
    for t in range(T):
        rows = [embp_ref[pl.ds(ids_ref[b, t], 1), :] for b in range(B)]
        x_steps.append(rows[0] if B == 1 else jnp.concatenate(rows, axis=0))

    whh = whh_ref[...]                       # (H, H) = W_hh^T, loaded once
    h = jnp.zeros((B, H), jnp.float32)       # PyTorch default h_0 = 0, in vregs

    # Fully unrolled recurrence (T is static): only h @ W_hh^T + add + tanh
    # remains on the serial critical path.
    # TODO(synk): per review, could shave per-step latency further by driving
    # the MXU directly (pltpu.matmul_push_rhs once + matmul_acc_lhs/pop per
    # step) or by a VPU small-K dot; needs on-device benchmarking, kept on
    # the portable jnp.dot path here.
    for t in range(T):
        h = jnp.tanh(x_steps[t] +
                     jnp.dot(h, whh, preferred_element_type=jnp.float32))

    # Final Linear on the last hidden state, written at exact (B, C) shape.
    out_ref[...] = (jnp.dot(h, wlin_ref[...], preferred_element_type=jnp.float32)
                    + blin_ref[...])


def prepare_params(params):
    """One-time parameter preparation (hoisted off the per-call hot path)."""
    emb = params["embedding"]                # (V, D)
    w_ih = params["w_ih"]                    # (H, D) torch layout
    w_hh = params["w_hh"]                    # (H, H) torch layout
    b_ih = params["b_ih"]                    # (H,)
    b_hh = params["b_hh"]                    # (H,)
    w_lin = params["w_lin"]                  # (C, H) torch layout
    b_lin = params["b_lin"]                  # (C,)
    C = w_lin.shape[0]
    return {
        # Fold embedding lookup + input projection + both RNN biases into one
        # (V, H) table: emb_proj[v] = emb[v] @ W_ih^T + b_ih + b_hh.
        "emb_proj": (emb @ w_ih.T + (b_ih + b_hh)).astype(jnp.float32),
        "w_hh_t": jnp.transpose(w_hh).astype(jnp.float32),      # (H, H)
        "w_lin_t": jnp.transpose(w_lin).astype(jnp.float32),    # (H, C)
        "b_lin": b_lin.reshape(1, C).astype(jnp.float32),       # (1, C)
    }


def torch_model_forward(x_tokens, prep):
    """Forward equivalent to TorchModel.forward(x) (y=None path): one pallas_call."""
    B, T = x_tokens.shape
    V, H = prep["emb_proj"].shape
    C = prep["w_lin_t"].shape[1]

    smem = pl.BlockSpec(memory_space=pltpu.MemorySpace.SMEM)
    vmem = pl.BlockSpec(memory_space=pltpu.MemorySpace.VMEM)

    flops = 2 * T * B * H * H + 2 * B * H * C
    bytes_accessed = 4 * (B * T + V * H + H * H + H * C + C + B * C)

    return pl.pallas_call(
        functools.partial(rnn_last_linear_kernel, T=T, B=B),
        out_shape=jax.ShapeDtypeStruct((B, C), jnp.float32),
        in_specs=[smem, vmem, vmem, vmem, vmem],
        out_specs=vmem,
        cost_estimate=pl.CostEstimate(flops=flops,
                                      transcendentals=T * B * H,
                                      bytes_accessed=bytes_accessed),
    )(x_tokens, prep["emb_proj"], prep["w_hh_t"], prep["w_lin_t"], prep["b_lin"])


def init_params(key, num_embeddings, embedding_dim, hidden_size, sentence_len):
    ks = jax.random.split(key, 7)
    s = 0.1
    return {
        "embedding": jax.random.normal(ks[0], (num_embeddings, embedding_dim), jnp.float32) * s,
        "w_ih": jax.random.normal(ks[1], (hidden_size, embedding_dim), jnp.float32) * s,
        "w_hh": jax.random.normal(ks[2], (hidden_size, hidden_size), jnp.float32) * s,
        "b_ih": jax.random.normal(ks[3], (hidden_size,), jnp.float32) * s,
        "b_hh": jax.random.normal(ks[4], (hidden_size,), jnp.float32) * s,
        "w_lin": jax.random.normal(ks[5], (sentence_len, hidden_size), jnp.float32) * s,
        "b_lin": jax.random.normal(ks[6], (sentence_len,), jnp.float32) * s,
    }


def reference_forward(x_tokens, params):
    """Pure-JAX reference mirroring the PyTorch forward (sanity check)."""
    x = jnp.take(params["embedding"], x_tokens, axis=0)      # (B, T, D)
    B, T, _ = x.shape
    H = params["w_hh"].shape[0]
    h = jnp.zeros((B, H), jnp.float32)
    for t in range(T):
        h = jnp.tanh(x[:, t, :] @ params["w_ih"].T + params["b_ih"]
                     + h @ params["w_hh"].T + params["b_hh"])
    return h @ params["w_lin"].T + params["b_lin"]


if __name__ == "__main__":
    # small shapes consistent with the module
    num_embeddings = 30   # vocab size
    embedding_dim = 32
    hidden_size = 32
    sentence_len = 8      # seq length AND number of output classes
    batch = 2

    key = jax.random.PRNGKey(0)
    pkey, xkey = jax.random.split(key)
    params = init_params(pkey, num_embeddings, embedding_dim, hidden_size, sentence_len)
    prep = prepare_params(params)   # one-time, off the hot path

    x = jax.random.randint(xkey, (batch, sentence_len), 0, num_embeddings, dtype=jnp.int32)

    y_pred = torch_model_forward(x, prep)
    y_pred = jax.block_until_ready(y_pred)

    # sanity check against pure-JAX reference
    y_ref = reference_forward(x, params)
    assert y_pred.shape == y_ref.shape, "shape mismatch vs reference"
    assert jnp.allclose(y_pred, y_ref, atol=1e-4, rtol=1e-4), "mismatch vs reference"

    # TODO(synk): CrossEntropyLoss (y is not None branch) not implemented in-kernel;
    # only the inference path (y_pred) is exercised here.
    print("KERNEL_OK")
</pallas_src>

<mosaic_0001>
module attributes {stable_mosaic.version = 11 : i64} {
  func.func @rnn_last_linear_kernel(%arg0: memref<2x8xi32, #tpu.memory_space<smem>>, %arg1: memref<30x32xf32, #tpu.memory_space<vmem>>, %arg2: memref<32x32xf32, #tpu.memory_space<vmem>>, %arg3: memref<32x8xf32, #tpu.memory_space<vmem>>, %arg4: memref<1x8xf32, #tpu.memory_space<vmem>>, %arg5: memref<2x8xf32, #tpu.memory_space<vmem>>) attributes {dimension_semantics = [], scalar_prefetch = 0 : i64, scratch_operands = 0 : i64, tpu.core_type = #tpu.core_type<tc>} {
    %c0 = arith.constant 0 : index
    %c0_0 = arith.constant 0 : index
    %0 = memref.load %arg0[%c0, %c0_0] : memref<2x8xi32, #tpu.memory_space<smem>>
    %1 = arith.index_cast %0 : i32 to index
    %c0_1 = arith.constant 0 : index
    %2 = vector.load %arg1[%1, %c0_1] : memref<30x32xf32, #tpu.memory_space<vmem>>, vector<1x32xf32>
    %c1 = arith.constant 1 : index
    %c0_2 = arith.constant 0 : index
    %3 = memref.load %arg0[%c1, %c0_2] : memref<2x8xi32, #tpu.memory_space<smem>>
    %4 = arith.index_cast %3 : i32 to index
    %c0_3 = arith.constant 0 : index
    %5 = vector.load %arg1[%4, %c0_3] : memref<30x32xf32, #tpu.memory_space<vmem>>, vector<1x32xf32>
    %6 = tpu.concatenate %2, %5 in 0 : vector<1x32xf32>, vector<1x32xf32> -> vector<2x32xf32>
    %c0_4 = arith.constant 0 : index
    %c1_5 = arith.constant 1 : index
    %7 = memref.load %arg0[%c0_4, %c1_5] : memref<2x8xi32, #tpu.memory_space<smem>>
    %8 = arith.index_cast %7 : i32 to index
    %c0_6 = arith.constant 0 : index
    %9 = vector.load %arg1[%8, %c0_6] : memref<30x32xf32, #tpu.memory_space<vmem>>, vector<1x32xf32>
    %c1_7 = arith.constant 1 : index
    %c1_8 = arith.constant 1 : index
    %10 = memref.load %arg0[%c1_7, %c1_8] : memref<2x8xi32, #tpu.memory_space<smem>>
    %11 = arith.index_cast %10 : i32 to index
    %c0_9 = arith.constant 0 : index
    %12 = vector.load %arg1[%11, %c0_9] : memref<30x32xf32, #tpu.memory_space<vmem>>, vector<1x32xf32>
    %13 = tpu.concatenate %9, %12 in 0 : vector<1x32xf32>, vector<1x32xf32> -> vector<2x32xf32>
    %c0_10 = arith.constant 0 : index
    %c2 = arith.constant 2 : index
    %14 = memref.load %arg0[%c0_10, %c2] : memref<2x8xi32, #tpu.memory_space<smem>>
    %15 = arith.index_cast %14 : i32 to index
    %c0_11 = arith.constant 0 : index
    %16 = vector.load %arg1[%15, %c0_11] : memref<30x32xf32, #tpu.memory_space<vmem>>, vector<1x32xf32>
    %c1_12 = arith.constant 1 : index
    %c2_13 = arith.constant 2 : index
    %17 = memref.load %arg0[%c1_12, %c2_13] : memref<2x8xi32, #tpu.memory_space<smem>>
    %18 = arith.index_cast %17 : i32 to index
    %c0_14 = arith.constant 0 : index
    %19 = vector.load %arg1[%18, %c0_14] : memref<30x32xf32, #tpu.memory_space<vmem>>, vector<1x32xf32>
    %20 = tpu.concatenate %16, %19 in 0 : vector<1x32xf32>, vector<1x32xf32> -> vector<2x32xf32>
    %c0_15 = arith.constant 0 : index
    %c3 = arith.constant 3 : index
    %21 = memref.load %arg0[%c0_15, %c3] : memref<2x8xi32, #tpu.memory_space<smem>>
    %22 = arith.index_cast %21 : i32 to index
    %c0_16 = arith.constant 0 : index
    %23 = vector.load %arg1[%22, %c0_16] : memref<30x32xf32, #tpu.memory_space<vmem>>, vector<1x32xf32>
    %c1_17 = arith.constant 1 : index
    %c3_18 = arith.constant 3 : index
    %24 = memref.load %arg0[%c1_17, %c3_18] : memref<2x8xi32, #tpu.memory_space<smem>>
    %25 = arith.index_cast %24 : i32 to index
    %c0_19 = arith.constant 0 : index
    %26 = vector.load %arg1[%25, %c0_19] : memref<30x32xf32, #tpu.memory_space<vmem>>, vector<1x32xf32>
    %27 = tpu.concatenate %23, %26 in 0 : vector<1x32xf32>, vector<1x32xf32> -> vector<2x32xf32>
    %c0_20 = arith.constant 0 : index
    %c4 = arith.constant 4 : index
    %28 = memref.load %arg0[%c0_20, %c4] : memref<2x8xi32, #tpu.memory_space<smem>>
    %29 = arith.index_cast %28 : i32 to index
    %c0_21 = arith.constant 0 : index
    %30 = vector.load %arg1[%29, %c0_21] : memref<30x32xf32, #tpu.memory_space<vmem>>, vector<1x32xf32>
    %c1_22 = arith.constant 1 : index
    %c4_23 = arith.constant 4 : index
    %31 = memref.load %arg0[%c1_22, %c4_23] : memref<2x8xi32, #tpu.memory_space<smem>>
    %32 = arith.index_cast %31 : i32 to index
    %c0_24 = arith.constant 0 : index
    %33 = vector.load %arg1[%32, %c0_24] : memref<30x32xf32, #tpu.memory_space<vmem>>, vector<1x32xf32>
    %34 = tpu.concatenate %30, %33 in 0 : vector<1x32xf32>, vector<1x32xf32> -> vector<2x32xf32>
    %c0_25 = arith.constant 0 : index
    %c5 = arith.constant 5 : index
    %35 = memref.load %arg0[%c0_25, %c5] : memref<2x8xi32, #tpu.memory_space<smem>>
    %36 = arith.index_cast %35 : i32 to index
    %c0_26 = arith.constant 0 : index
    %37 = vector.load %arg1[%36, %c0_26] : memref<30x32xf32, #tpu.memory_space<vmem>>, vector<1x32xf32>
    %c1_27 = arith.constant 1 : index
    %c5_28 = arith.constant 5 : index
    %38 = memref.load %arg0[%c1_27, %c5_28] : memref<2x8xi32, #tpu.memory_space<smem>>
    %39 = arith.index_cast %38 : i32 to index
    %c0_29 = arith.constant 0 : index
    %40 = vector.load %arg1[%39, %c0_29] : memref<30x32xf32, #tpu.memory_space<vmem>>, vector<1x32xf32>
    %41 = tpu.concatenate %37, %40 in 0 : vector<1x32xf32>, vector<1x32xf32> -> vector<2x32xf32>
    %c0_30 = arith.constant 0 : index
    %c6 = arith.constant 6 : index
    %42 = memref.load %arg0[%c0_30, %c6] : memref<2x8xi32, #tpu.memory_space<smem>>
    %43 = arith.index_cast %42 : i32 to index
    %c0_31 = arith.constant 0 : index
    %44 = vector.load %arg1[%43, %c0_31] : memref<30x32xf32, #tpu.memory_space<vmem>>, vector<1x32xf32>
    %c1_32 = arith.constant 1 : index
    %c6_33 = arith.constant 6 : index
    %45 = memref.load %arg0[%c1_32, %c6_33] : memref<2x8xi32, #tpu.memory_space<smem>>
    %46 = arith.index_cast %45 : i32 to index
    %c0_34 = arith.constant 0 : index
    %47 = vector.load %arg1[%46, %c0_34] : memref<30x32xf32, #tpu.memory_space<vmem>>, vector<1x32xf32>
    %48 = tpu.concatenate %44, %47 in 0 : vector<1x32xf32>, vector<1x32xf32> -> vector<2x32xf32>
    %c0_35 = arith.constant 0 : index
    %c7 = arith.constant 7 : index
    %49 = memref.load %arg0[%c0_35, %c7] : memref<2x8xi32, #tpu.memory_space<smem>>
    %50 = arith.index_cast %49 : i32 to index
    %c0_36 = arith.constant 0 : index
    %51 = vector.load %arg1[%50, %c0_36] : memref<30x32xf32, #tpu.memory_space<vmem>>, vector<1x32xf32>
    %c1_37 = arith.constant 1 : index
    %c7_38 = arith.constant 7 : index
    %52 = memref.load %arg0[%c1_37, %c7_38] : memref<2x8xi32, #tpu.memory_space<smem>>
    %53 = arith.index_cast %52 : i32 to index
    %c0_39 = arith.constant 0 : index
    %54 = vector.load %arg1[%53, %c0_39] : memref<30x32xf32, #tpu.memory_space<vmem>>, vector<1x32xf32>
    %55 = tpu.concatenate %51, %54 in 0 : vector<1x32xf32>, vector<1x32xf32> -> vector<2x32xf32>
    %c0_40 = arith.constant 0 : index
    %c0_41 = arith.constant 0 : index
    %56 = vector.load %arg2[%c0_40, %c0_41] : memref<32x32xf32, #tpu.memory_space<vmem>>, vector<32x32xf32>
    %cst = arith.constant 0.000000e+00 : f32
    %57 = vector.broadcast %cst : f32 to vector<2x32xf32>
    %cst_42 = arith.constant dense<0.000000e+00> : vector<2x32xf32>
    %58 = tpu.matmul %57, %56, %cst_42 {dimension_numbers = #tpu.dot_dimension_numbers<[1], [0], [0], [1], [0, 0, 1, 1], [], []>} : vector<2x32xf32>, vector<32x32xf32>, vector<2x32xf32> -> vector<2x32xf32>
    %59 = arith.addf %6, %58 : vector<2x32xf32>
    %60 = math.tanh %59 : vector<2x32xf32>
    %cst_43 = arith.constant dense<0.000000e+00> : vector<2x32xf32>
    %61 = tpu.matmul %60, %56, %cst_43 {dimension_numbers = #tpu.dot_dimension_numbers<[1], [0], [0], [1], [0, 0, 1, 1], [], []>} : vector<2x32xf32>, vector<32x32xf32>, vector<2x32xf32> -> vector<2x32xf32>
    %62 = arith.addf %13, %61 : vector<2x32xf32>
    %63 = math.tanh %62 : vector<2x32xf32>
    %cst_44 = arith.constant dense<0.000000e+00> : vector<2x32xf32>
    %64 = tpu.matmul %63, %56, %cst_44 {dimension_numbers = #tpu.dot_dimension_numbers<[1], [0], [0], [1], [0, 0, 1, 1], [], []>} : vector<2x32xf32>, vector<32x32xf32>, vector<2x32xf32> -> vector<2x32xf32>
    %65 = arith.addf %20, %64 : vector<2x32xf32>
    %66 = math.tanh %65 : vector<2x32xf32>
    %cst_45 = arith.constant dense<0.000000e+00> : vector<2x32xf32>
    %67 = tpu.matmul %66, %56, %cst_45 {dimension_numbers = #tpu.dot_dimension_numbers<[1], [0], [0], [1], [0, 0, 1, 1], [], []>} : vector<2x32xf32>, vector<32x32xf32>, vector<2x32xf32> -> vector<2x32xf32>
    %68 = arith.addf %27, %67 : vector<2x32xf32>
    %69 = math.tanh %68 : vector<2x32xf32>
    %cst_46 = arith.constant dense<0.000000e+00> : vector<2x32xf32>
    %70 = tpu.matmul %69, %56, %cst_46 {dimension_numbers = #tpu.dot_dimension_numbers<[1], [0], [0], [1], [0, 0, 1, 1], [], []>} : vector<2x32xf32>, vector<32x32xf32>, vector<2x32xf32> -> vector<2x32xf32>
    %71 = arith.addf %34, %70 : vector<2x32xf32>
    %72 = math.tanh %71 : vector<2x32xf32>
    %cst_47 = arith.constant dense<0.000000e+00> : vector<2x32xf32>
    %73 = tpu.matmul %72, %56, %cst_47 {dimension_numbers = #tpu.dot_dimension_numbers<[1], [0], [0], [1], [0, 0, 1, 1], [], []>} : vector<2x32xf32>, vector<32x32xf32>, vector<2x32xf32> -> vector<2x32xf32>
    %74 = arith.addf %41, %73 : vector<2x32xf32>
    %75 = math.tanh %74 : vector<2x32xf32>
    %cst_48 = arith.constant dense<0.000000e+00> : vector<2x32xf32>
    %76 = tpu.matmul %75, %56, %cst_48 {dimension_numbers = #tpu.dot_dimension_numbers<[1], [0], [0], [1], [0, 0, 1, 1], [], []>} : vector<2x32xf32>, vector<32x32xf32>, vector<2x32xf32> -> vector<2x32xf32>
    %77 = arith.addf %48, %76 : vector<2x32xf32>
    %78 = math.tanh %77 : vector<2x32xf32>
    %cst_49 = arith.constant dense<0.000000e+00> : vector<2x32xf32>
    %79 = tpu.matmul %78, %56, %cst_49 {dimension_numbers = #tpu.dot_dimension_numbers<[1], [0], [0], [1], [0, 0, 1, 1], [], []>} : vector<2x32xf32>, vector<32x32xf32>, vector<2x32xf32> -> vector<2x32xf32>
    %80 = arith.addf %55, %79 : vector<2x32xf32>
    %81 = math.tanh %80 : vector<2x32xf32>
    %c0_50 = arith.constant 0 : index
    %c0_51 = arith.constant 0 : index
    %82 = vector.load %arg3[%c0_50, %c0_51] : memref<32x8xf32, #tpu.memory_space<vmem>>, vector<32x8xf32>
    %cst_52 = arith.constant dense<0.000000e+00> : vector<2x8xf32>
    %83 = tpu.matmul %81, %82, %cst_52 {dimension_numbers = #tpu.dot_dimension_numbers<[1], [0], [0], [1], [0, 0, 1, 1], [], []>} : vector<2x32xf32>, vector<32x8xf32>, vector<2x8xf32> -> vector<2x8xf32>
    %c0_53 = arith.constant 0 : index
    %c0_54 = arith.constant 0 : index
    %84 = vector.load %arg4[%c0_53, %c0_54] : memref<1x8xf32, #tpu.memory_space<vmem>>, vector<1x8xf32>
    %85 = vector.broadcast %84 : vector<1x8xf32> to vector<2x8xf32>
    %86 = arith.addf %83, %85 : vector<2x8xf32>
    %c0_55 = arith.constant 0 : index
    %c0_56 = arith.constant 0 : index
    %87 = vector.load %arg5[%c0_55, %c0_56] : memref<2x8xf32, #tpu.memory_space<vmem>>, vector<2x8xf32>
    tpu.vector_store %arg5[%c0_55, %c0_56], %86 {strides = array<i32>} : memref<2x8xf32, #tpu.memory_space<vmem>>, vector<2x8xf32>,
    return
  }
}

</mosaic_0001>

<bundles_post_ra>
// kernel: tpu_custom_call.1
= control target key start
LH: loop header
LB: loop body
LE: loop exit
PB: predicated region body
PF: predicated region fallthrough
CT: control target
= control target key end

     0   :  { %10 = vsyncpa [#allocation5], 0  ;;  %s1361_s0 = inlined_call_operand.vmem [shape: s32[2,8], index: 0, kind: input, shape index: {}]   ;;  %s1362_s1 = inlined_call_operand.vmem [shape: f32[30,32], index: 1, kind: input, shape index: {}]   ;;  %s1363_s2 = inlined_call_operand.hbm [shape: f32[32,32], index: 2, kind: input, shape index: {}]   ;;  %s1364_s3 = inlined_call_operand.vmem [shape: f32[32,8], index: 3, kind: input, shape index: {}]   ;;  %s1365_s4 = inlined_call_operand.vmem [shape: f32[1,8], index: 4, kind: input, shape index: {}]   ;;  %s1366_s5 = inlined_call_operand.hbm [shape: f32[2,8], index: 5, kind: output, shape index: {}]  }
   0x1   :  { %11 = vsyncpa [#allocation3], 0 }
   0x2   :  { %12 = vsyncpa [#allocation4], 0  ;;  %s19_s20 = sshll.u32 %s1361_s0, 4  ;;  %s20_s20 = int_to_ptr.vmem [resolvable:$true] %s19_s20 }
   0x3   :  { %s1098_s21 = scalar_lea.vmem %s20_s20, 32  ;;  %p1103_p1 = scmp.lt.s32.totalorder %s20_s20, %s20_s20 }
   0x4   :  { %p1099_p0 = scmp.ne.s32.totalorder %s20_s20, %s1098_s21  ;;  %p1104_p2 = scmp.lt.s32.totalorder %s1098_s21, %s1098_s21 }
   0x6   :  { %p1105_p3 = por %p1104_p2, %p1103_p1 }
   0x8   :  { %p1106_p4 = pnand %p1105_p3, %p1099_p0 }
   0xa   :  { %1109 = shalt.err (!%p1106_p4)
}
   0xb   :  { %s1160_s22 = smov [#allocation2]   ;;  %s1161_s23 = smov [#allocation6]  }
   0xc   :  { %22 = dma.vmem_to_smem %s20_s20, 32, %s1160_s22, [#allocation5]  }
   0xd   :  { %s30_s24 = sshll.u32 %s1161_s23, 4  ;;  %s1110_s27 = scalar_lea.hbm %s1363_s2, 512  ;;  %s31_s24 = int_to_ptr.vmem [resolvable:$true] %s30_s24 }
   0xe   :  { %p1111_p5 = scmp.ne.s32.totalorder %s1363_s2, %s1110_s27  ;;  %p1114_p6 = scmp.lt.u32.totalorder %s1110_s27, %s1363_s2 }
  0x10   :  { %p1116_p7 = pnand %p1114_p6, %p1111_p5 }
  0x12   :  { %1119 = shalt.err (!%p1116_p7)
}
  0x13   :  { %s1120_s6 = scalar_lea.vmem %s31_s24, 512  ;;  %p1125_p9 = scmp.lt.s32.totalorder %s31_s24, %s31_s24 }
  0x14   :  { %p1121_p8 = scmp.ne.s32.totalorder %s31_s24, %s1120_s6  ;;  %p1126_p10 = scmp.lt.s32.totalorder %s1120_s6, %s1120_s6 }
  0x16   :  { %p1127_p11 = por %p1126_p10, %p1125_p9 }
  0x18   :  { %p1128_p12 = pnand %p1127_p11, %p1121_p8 }
  0x1a   :  { %1131 = shalt.err (!%p1128_p12)
}
  0x1b   :  { %s1162_s7 = smov 128   ;;  %s1163_s8 = smov 8  }
  0x1c   :  { %36 = dma.hbm_to_vmem [thread:$0]  %s1363_s2, 512, %s31_s24, [#allocation3], %s1162_s7, %s1162_s7, %s1163_s8  }
  0x1d   :  { %1154 = dma.done.wait [#allocation5], 32  }
  0x1e   :  { %1155 = vsyncadd [#allocation5], 4294967264 }
  0x1f   :  { %1156 = dma.done.wait [#allocation3], 512  }
  0x20   :  { %1157 = vsyncadd [#allocation3], 4294966784 }
  0x21   :  { %47 = sfence }
  0x22   :  { %v129_v0 = vld [vmem:[#allocation6] sm:$0xff]  ;;  %v130_v1 = vld [vmem:[#allocation6 + $0x8] sm:$0xff]  ;;  %v131_v2 = vld [vmem:[#allocation6 + $0x10] sm:$0xff]  ;;  %v1164_v3 = vmov 0.0|0.0   ;;  %vm1165_vm0 = vmmov 0   ;;  %v1166_v6 = vmov 0.0  }
  0x23   :  { %1020 = vmatprep.subr.bf16.mxu0 %v1164_v3  ;;  %v1214_v4 = vpack.c.bf16 %v130_v1, %v129_v0  ;;  %v132_v5 = vld [vmem:[#allocation6 + $0x18] sm:$0xff]  ;;  %929 = vmatprep.mubr.msk.f32.mxu0 %vm1165_vm0, %v1166_v6  ;;  %s852_s2 = sld [smem:[#allocation2 + $0x80]]  ;;  %vm57_vm1 = vcmask 1040384   ;;  %vm133_vm2 = vcmask 261120   ;;  %s854_s18 = sld [smem:[#allocation2 + $0x81]]  ;;  %v734_v0 = vld [vmem:[%s1364_s3] sm:$0xff] }
  0x24   :  { %1026 = vmatprep.subr.bf16.mxu1 %v1164_v3  ;;  %940 = vmatprep.mubr.msk.f32.mxu1 %vm1165_vm0, %v1166_v6  ;;  %v1222_v7 = vpack.c.bf16 %v132_v5, %v131_v2  ;;  %s48_s11 = sld [smem:[#allocation2]]  ;;  %s853_s19 = sld [smem:[#allocation2 + $0x1]]  ;;  %v735_v1 = vld [vmem:[%s1364_s3 + $0x8] sm:$0xff]  ;;  %v736_v2 = vld [vmem:[%s1364_s3 + $0x10] sm:$0xff]  ;;  %v737_v5 = vld [vmem:[%s1364_s3 + $0x18] sm:$0xff]  ;;  %vm818_vm3 = vcmask 58368  }
  0x25   :  { %1022 = vmatpush3.bf16.msra.mxu0 %v1214_v4  ;;  %1028 = vmatpush3.bf16.msra.mxu1 %v1214_v4  ;;  %s856_s26 = sld [smem:[#allocation2 + $0x82]]  ;;  %s858_s8 = sld [smem:[#allocation2 + $0x83]] }
  0x26   :  { %1023 = vmatprep.subr.bf16.mxu0 %v1164_v3  ;;  %1029 = vmatprep.subr.bf16.mxu1 %v1164_v3  ;;  %s855_s27 = sld [smem:[#allocation2 + $0x2]]  ;;  %s857_s9 = sld [smem:[#allocation2 + $0x3]] }
  0x27   :  { %s860_s15 = sld [smem:[#allocation2 + $0x84]]  ;;  %s862_s23 = sld [smem:[#allocation2 + $0x85]] }
  0x28   :  { %s859_s16 = sld [smem:[#allocation2 + $0x4]]  ;;  %s861_s24 = sld [smem:[#allocation2 + $0x5]] }
  0x29   :  { %1025 = vmatpush3.bf16.msra.mxu0 %v1222_v7  ;;  %1031 = vmatpush3.bf16.msra.mxu1 %v1222_v7  ;;  %s52_s14 = scalar_lea.vmem %s1362_s1, %s852_s2  ;;  %s63_s22 = scalar_lea.vmem %s1362_s1, %s854_s18 }
  0x2a   :  { %1032 = vmatprep.subr.bf16.mxu0 %v1164_v3  ;;  %1038 = vmatprep.subr.bf16.mxu1 %v1164_v3  ;;  %v53_v8 = vld [vmem:[%s52_s14] sm:$0x1]  ;;  %s49_s17 = scalar_lea.vmem %s1362_s1, %s48_s11  ;;  %s60_s25 = scalar_lea.vmem %s1362_s1, %s853_s19 }
  0x2b   :  { %v55_v9 = vrot.slane %v53_v8, 7  ;;  %v50_v10 = vld [vmem:[%s49_s17] sm:$0x1]  ;;  %s73_s0 = scalar_lea.vmem %s1362_s1, %s856_s26  ;;  %s83_s11 = scalar_lea.vmem %s1362_s1, %s858_s8 }
  0x2c   :  { %930 = vmatmul.mubr.f32.vlgmr.msra.gmra.mrb[0].mxu0 %v1166_v6  ;;  %v64_v16 = vld [vmem:[%s63_s22] sm:$0x1]  ;;  %s70_s7 = scalar_lea.vmem %s1362_s1, %s855_s27  ;;  %s80_s14 = scalar_lea.vmem %s1362_s1, %s857_s9 }
  0x2d   :  { %1034 = vmatpush3.bf16.msra.mxu0 %v1214_v4  ;;  %951 = vmatprep.mubr.msk.f32.mxu0 %vm1165_vm0, %v1166_v6  ;;  %v58_v11 = vsel %vm57_vm1, %v50_v10, %v55_v9  ;;  %v66_v17 = vrot.slane %v64_v16, 7  ;;  %v61_v18 = vld [vmem:[%s60_s25] sm:$0x1]  ;;  %s93_s19 = scalar_lea.vmem %s1362_s1, %s860_s15  ;;  %s103_s27 = scalar_lea.vmem %s1362_s1, %s862_s23 }
  0x2e   :  { %1035 = vmatprep.subr.bf16.mxu0 %v1164_v3  ;;  %v74_v24 = vld [vmem:[%s73_s0] sm:$0x1]  ;;  %s90_s22 = scalar_lea.vmem %s1362_s1, %s859_s16  ;;  %s100_s0 = scalar_lea.vmem %s1362_s1, %s861_s24 }
  0x2f   :  { %v68_v19 = vsel %vm57_vm1, %v61_v18, %v66_v17  ;;  %v76_v25 = vrot.slane %v74_v24, 7  ;;  %v71_v26 = vld [vmem:[%s70_s7] sm:$0x1]  ;;  %s864_s30 = sld [smem:[#allocation2 + $0x86]]  ;;  %s866_s20 = sld [smem:[#allocation2 + $0x87]] }
  0x30   :  { %v84_v32 = vld [vmem:[%s83_s11] sm:$0x1]  ;;  %s863_s6 = sld [smem:[#allocation2 + $0x6]]  ;;  %s865_s21 = sld [smem:[#allocation2 + $0x7]] }
  0x31   :  { %1037 = vmatpush3.bf16.msra.mxu0 %v1222_v7  ;;  %v78_v27 = vsel %vm57_vm1, %v71_v26, %v76_v25  ;;  %v86_v33 = vrot.slane %v84_v32, 7  ;;  %v81_v34 = vld [vmem:[%s80_s14] sm:$0x1]  ;;  %s1167_s29 = smov [#allocation7]  }
  0x32   :  { %1044 = vmatprep.subr.bf16.mxu0 %v1164_v3  ;;  %v94_v40 = vld [vmem:[%s93_s19] sm:$0x1] }
  0x33   :  { %v88_v35 = vsel %vm57_vm1, %v81_v34, %v86_v33  ;;  %v96_v41 = vrot.slane %v94_v40, 7  ;;  %v91_v42 = vld [vmem:[%s90_s22] sm:$0x1] }
  0x34   :  { %v104_v48 = vld [vmem:[%s103_s27] sm:$0x1] }
  0x35   :  { %v98_v43 = vsel %vm57_vm1, %v91_v42, %v96_v41  ;;  %v106_v49 = vrot.slane %v104_v48, 7  ;;  %v101_v50 = vld [vmem:[%s100_s0] sm:$0x1]  ;;  %s113_s9 = scalar_lea.vmem %s1362_s1, %s864_s30  ;;  %s123_s24 = scalar_lea.vmem %s1362_s1, %s866_s20 }
  0x36   :  { %v114_v56 = vld [vmem:[%s113_s9] sm:$0x1]  ;;  %s110_s11 = scalar_lea.vmem %s1362_s1, %s863_s6  ;;  %s120_s27 = scalar_lea.vmem %s1362_s1, %s865_s21 }
  0x37   :  { %v108_v51 = vsel %vm57_vm1, %v101_v50, %v106_v49  ;;  %v116_v57 = vrot.slane %v114_v56, 7  ;;  %v111_v58 = vld [vmem:[%s110_s11] sm:$0x1]  ;;  %s826_s0 = sshll.u32 %s1167_s29, 4  ;;  %s827_s0 = int_to_ptr.vmem [resolvable:$true] %s826_s0 }
  0x38   :  { %v121_v9 = vld [vmem:[%s120_s27] sm:$0x1]  ;;  %s1132_s1 = scalar_lea.vmem %s827_s0, 32  ;;  %p1137_p0 = scmp.lt.s32.totalorder %s827_s0, %s827_s0 }
  0x39   :  { %v118_v59 = vsel %vm57_vm1, %v111_v58, %v116_v57  ;;  %p1133_p13 = scmp.ne.s32.totalorder %s827_s0, %s1132_s1  ;;  %p1138_p1 = scmp.lt.s32.totalorder %s1132_s1, %s1132_s1 }
  0x3b   :  { %p1139_p2 = por %p1138_p1, %p1137_p0 }
  0x3d   :  { %p1140_p3 = pnand %p1139_p2, %p1133_p13 }
  0xff   :  { %v203_v12 = vpop.f32.mrb[0].mxu0 }
 0x100   :  { %v207_v13 = vadd.f32 %v203_v12, %v58_v11  ;;  %v931_v14 = vpop.f32.mrb[1].mxu0 }
 0x101   :  { %v874_v14 = vld [vmem:[%s1365_s4] ss:$0 sm:$0xff] }
 0x102   :  { %1082 = vtanh.f32 %v207_v13 }
 0x10c   :  { %v1083_v15 = vpop.eup %1082 }
 0x10d   :  { %941 = vmatmul.mubr.msk.f32.vlgmr.msra.gmra.mrb[0].mxu1 %vm133_vm2, %v1083_v15 }
 0x10e   :  { %1040 = vmatpush3.bf16.msra.mxu1 %v1214_v4  ;;  %962 = vmatprep.mubr.msk.f32.mxu1 %vm1165_vm0, %v1166_v6 }
 0x10f   :  { %1041 = vmatprep.subr.bf16.mxu1 %v1164_v3 }
 0x112   :  { %1043 = vmatpush3.bf16.msra.mxu1 %v1222_v7 }
 0x113   :  { %1050 = vmatprep.subr.bf16.mxu1 %v1164_v3 }
 0x1e0   :  { %v278_v20 = vpop.f32.mrb[0].mxu1 }
 0x1e1   :  { %v282_v21 = vadd.f32 %v278_v20, %v68_v19  ;;  %v942_v22 = vpop.f32.mrb[1].mxu1 }
 0x1e3   :  { %1084 = vtanh.f32 %v282_v21 }
 0x1ed   :  { %v1085_v23 = vpop.eup %1084 }
 0x1ee   :  { %952 = vmatmul.mubr.msk.f32.vlgmr.msra.gmra.mrb[2].mxu0 %vm133_vm2, %v1085_v23 }
 0x1ef   :  { %1046 = vmatpush3.bf16.msra.mxu0 %v1214_v4  ;;  %973 = vmatprep.mubr.msk.f32.mxu0 %vm1165_vm0, %v1166_v6 }
 0x1f0   :  { %1047 = vmatprep.subr.bf16.mxu0 %v1164_v3 }
 0x1f3   :  { %1049 = vmatpush3.bf16.msra.mxu0 %v1222_v7 }
 0x1f4   :  { %1056 = vmatprep.subr.bf16.mxu0 %v1164_v3 }
 0x2c1   :  { %v353_v28 = vpop.f32.mrb[2].mxu0 }
 0x2c2   :  { %v357_v29 = vadd.f32 %v353_v28, %v78_v27  ;;  %v953_v30 = vpop.f32.mrb[3].mxu0 }
 0x2c4   :  { %1086 = vtanh.f32 %v357_v29 }
 0x2ce   :  { %v1087_v31 = vpop.eup %1086 }
 0x2cf   :  { %963 = vmatmul.mubr.msk.f32.vlgmr.msra.gmra.mrb[2].mxu1 %vm133_vm2, %v1087_v31 }
 0x2d0   :  { %1052 = vmatpush3.bf16.msra.mxu1 %v1214_v4  ;;  %984 = vmatprep.mubr.msk.f32.mxu1 %vm1165_vm0, %v1166_v6 }
 0x2d1   :  { %1053 = vmatprep.subr.bf16.mxu1 %v1164_v3 }
 0x2d4   :  { %1055 = vmatpush3.bf16.msra.mxu1 %v1222_v7 }
 0x2d5   :  { %1062 = vmatprep.subr.bf16.mxu1 %v1164_v3 }
 0x3a2   :  { %v428_v36 = vpop.f32.mrb[2].mxu1 }
 0x3a3   :  { %v432_v37 = vadd.f32 %v428_v36, %v88_v35  ;;  %v964_v38 = vpop.f32.mrb[3].mxu1 }
 0x3a5   :  { %1088 = vtanh.f32 %v432_v37 }
 0x3af   :  { %v1089_v39 = vpop.eup %1088 }
 0x3b0   :  { %974 = vmatmul.mubr.msk.f32.vlgmr.msra.gmra.mrb[4].mxu0 %vm133_vm2, %v1089_v39 }
 0x3b1   :  { %1058 = vmatpush3.bf16.msra.mxu0 %v1214_v4  ;;  %995 = vmatprep.mubr.msk.f32.mxu0 %vm1165_vm0, %v1166_v6 }
 0x3b2   :  { %1059 = vmatprep.subr.bf16.mxu0 %v1164_v3 }
 0x3b5   :  { %1061 = vmatpush3.bf16.msra.mxu0 %v1222_v7 }
 0x3b6   :  { %1068 = vmatprep.subr.bf16.mxu0 %v1164_v3 }
 0x483   :  { %v503_v44 = vpop.f32.mrb[4].mxu0 }
 0x484   :  { %v507_v45 = vadd.f32 %v503_v44, %v98_v43  ;;  %v975_v46 = vpop.f32.mrb[5].mxu0 }
 0x486   :  { %1090 = vtanh.f32 %v507_v45 }
 0x490   :  { %v1091_v47 = vpop.eup %1090 }
 0x491   :  { %985 = vmatmul.mubr.msk.f32.vlgmr.msra.gmra.mrb[4].mxu1 %vm133_vm2, %v1091_v47 }
 0x492   :  { %1064 = vmatpush3.bf16.msra.mxu1 %v1214_v4  ;;  %1006 = vmatprep.mubr.msk.f32.mxu1 %vm1165_vm0, %v1166_v6  ;;  %v1069_v4 = vpack.c.bf16 %v735_v1, %v734_v0 }
 0x493   :  { %1065 = vmatprep.subr.bf16.mxu1 %v1164_v3 }
 0x496   :  { %1067 = vmatpush3.bf16.msra.mxu1 %v1222_v7  ;;  %v124_v7 = vld [vmem:[%s123_s24] sm:$0x1] }
 0x497   :  { %v126_v8 = vrot.slane %v124_v7, 7 }
 0x499   :  { %v128_v10 = vsel %vm57_vm1, %v121_v9, %v126_v8 }
 0x564   :  { %v578_v52 = vpop.f32.mrb[4].mxu1 }
 0x565   :  { %v582_v53 = vadd.f32 %v578_v52, %v108_v51  ;;  %v986_v54 = vpop.f32.mrb[5].mxu1 }
 0x567   :  { %1092 = vtanh.f32 %v582_v53 }
 0x571   :  { %v1093_v55 = vpop.eup %1092 }
 0x572   :  { %996 = vmatmul.mubr.msk.f32.vlgmr.msra.gmra.mrb[6].mxu0 %vm133_vm2, %v1093_v55 }
 0x573   :  { %1017 = vmatprep.mubr.msk.f32.mxu0 %vm1165_vm0, %v1166_v6  ;;  %1070 = vmatpush3.bf16.msra.mxu0 %v1069_v4  ;;  %v1072_v6 = vpack.c.bf16 %v737_v5, %v736_v2 }
 0x574   :  { %1071 = vmatprep.subr.bf16.mxu0 %v1164_v3 }
 0x577   :  { %1073 = vmatpush3.bf16.msra.mxu0 %v1072_v6 }
 0x645   :  { %v653_v60 = vpop.f32.mrb[6].mxu0 }
 0x646   :  { %v657_v61 = vadd.f32 %v653_v60, %v118_v59  ;;  %v997_v62 = vpop.f32.mrb[7].mxu0 }
 0x648   :  { %1094 = vtanh.f32 %v657_v61 }
 0x652   :  { %v1095_v63 = vpop.eup %1094 }
 0x653   :  { %1007 = vmatmul.mubr.msk.f32.vlgmr.msra.gmra.mrb[6].mxu1 %vm133_vm2, %v1095_v63 }
 0x726   :  { %v728_v11 = vpop.f32.mrb[6].mxu1 }
 0x727   :  { %v732_v12 = vadd.f32 %v728_v11, %v128_v10  ;;  %v1008_v13 = vpop.f32.mrb[7].mxu1 }
 0x729   :  { %1096 = vtanh.f32 %v732_v12 }
 0x733   :  { %v1097_v3 = vpop.eup %1096 }
 0x734   :  { %1018 = vmatmul.mubr.msk.f32.vlgmr.msra.gmra.mrb[8].mxu0 %vm133_vm2, %v1097_v3 }
 0x807   :  { %v814_v15 = vpop.f32.mrb[8].mxu0 }
 0x808   :  { %v815_v16 = vadd.f32 %v874_v14, %v814_v15  ;;  %v1019_v17 = vpop.f32.mrb[9].mxu0 }
 0x80a   :  { %819 = vst.msk [vmem:[#allocation7] sm:$0x3] %vm818_vm3, %v815_v16 }
 0x80b   :  { %1143 = shalt.err (!%p1140_p3)
}
 0x80c   :  { %s1144_s7 = scalar_lea.hbm %s1366_s5, 32 }
 0x80d   :  { %p1145_p4 = scmp.ne.s32.totalorder %s1366_s5, %s1144_s7  ;;  %p1148_p5 = scmp.lt.u32.totalorder %s1144_s7, %s1366_s5 }
 0x80f   :  { %p1150_p6 = pnand %p1148_p5, %p1145_p4 }
 0x811   :  { %1153 = shalt.err (!%p1150_p6)
}
 0x812   :  { %829 = dma.vmem_to_hbm [thread:$0]  %s827_s0, 32, %s1366_s5, [#allocation4]  }
 0x813   :  { %1158 = dma.done.wait [#allocation4], 32  }
 0x814   :  { %1159 = vsyncadd [#allocation4], 4294967264 }
 0x815   :  { %833 = vsyncpa [#allocation3], 1 }
 0x816   :  { %834 = vsyncpa [#allocation4], 1 }
 0x817   :  { %835 = vsyncpa [#allocation5], 1 }

</bundles_post_ra>
